<compile_context>
chip_gen: v5e
topology: v5e:2x2
jax: 0.10.0
libtpu: 0.0.40
codegen_flags: <defaults>
</compile_context>

<pallas_src>
import functools

import jax
import jax.numpy as jnp
from jax.experimental import pallas as pl
from jax.experimental.pallas import tpu as pltpu


_FAST_PATH_BYTES = 64 * 1024      # below this, fused XLA elementwise wins
_MIN_SPLIT_BYTES = 1 << 20        # above this, keep >=2 grid steps
_SUBLANE_MULT = {1: 32, 2: 16, 4: 8, 8: 8}


def _ceil_div(a, b):
    return -(-a // b)


@functools.lru_cache(maxsize=1)
def _chip_config():
    """Generation-specific block-size / VMEM-limit / core-count config."""
    try:
        kind = jax.devices()[0].device_kind.lower()
    except Exception:  # pragma: no cover - defensive
        kind = ""
    if "v6" in kind:
        # 128 MiB physical VMEM; 8 MiB blocks * (in+out) * 2 buffers = 32 MiB,
        # so raise the scoped limit above the 32 MiB default.
        return {"block_bytes": 8 << 20, "vmem_limit": 48 << 20, "two_tc": False}
    if "v7" in kind:
        # 64 MiB physical / 32 MiB scoped default per TC; 4 MiB blocks keep the
        # double-buffered footprint at 16 MiB.  2 TensorCores per chip.
        return {"block_bytes": 4 << 20, "vmem_limit": None, "two_tc": True}
    # v5e (16 MiB scoped default) / unknown: conservative 2 MiB blocks (8 MiB
    # footprint), already >5 us per step so launch overhead is fully hidden.
    return {"block_bytes": 2 << 20, "vmem_limit": None, "two_tc": False}


def _coords_kernel(scale_ref, x_ref, o_ref):
    # tanh runs on the EUP; the scale multiply co-issues on an otherwise idle
    # VPU slot -- neither is the binding unit for this HBM-bound stream.
    scale = scale_ref[0]
    o_ref[...] = (scale * jnp.tanh(x_ref[...].astype(jnp.float32))).astype(o_ref.dtype)


def coords(x, max_value):
    """out = max_value * tanh(x), preserving input shape and dtype."""
    orig_shape = x.shape
    dtype = x.dtype
    n = x.size
    itemsize = jnp.dtype(dtype).itemsize
    nbytes = n * itemsize

    # Fast path: tiny tensors or sizes not divisible by 128.  A fused XLA
    # elementwise op is already at the HBM roofline and avoids the fixed
    # pallas_call launch cost and any pad/slice full-array copies.
    if n == 0 or nbytes < _FAST_PATH_BYTES or n % 128 != 0:
        return (max_value * jnp.tanh(x.astype(jnp.float32))).astype(dtype)

    cfg = _chip_config()
    sub_mult = _SUBLANE_MULT.get(itemsize, 8)

    # Widest lane dimension (multiple of 128) that exactly divides n: no
    # padding copies, long contiguous DMA rows, unmasked full-width stores.
    lane = 128
    for cand in (2048, 1024, 512, 256, 128):
        if n % cand == 0:
            lane = cand
            break
    rows = n // lane
    x2d = jnp.reshape(x, (rows, lane))  # contiguous flatten+reshape: free

    # Block rows for ~block_bytes blocks, rounded to the packed-sublane
    # multiple; a full-extent block is always legal regardless of divisibility.
    row_bytes = lane * itemsize
    block_rows = max(sub_mult, (cfg["block_bytes"] // row_bytes // sub_mult) * sub_mult)
    if block_rows > rows:
        block_rows = rows

    if nbytes > _MIN_SPLIT_BYTES:
        # Keep >=2 grid steps (even on 2-TC chips) so the "parallel" axis can
        # shard across both TensorCores, and rebalance block_rows so the last
        # step is not a tiny tail.
        nblk = max(2, _ceil_div(rows, block_rows))
        if cfg["two_tc"] and nblk % 2 == 1:
            nblk += 1
        block_rows = _ceil_div(_ceil_div(rows, nblk), sub_mult) * sub_mult
        block_rows = min(block_rows, rows)

    grid = (pl.cdiv(rows, block_rows),)

    cp_kwargs = {"dimension_semantics": ("parallel",)}
    if cfg["vmem_limit"] is not None:
        cp_kwargs["vmem_limit_bytes"] = cfg["vmem_limit"]

    scale = jnp.reshape(jnp.asarray(max_value, dtype=jnp.float32), (1,))

    out2d = pl.pallas_call(
        _coords_kernel,
        out_shape=jax.ShapeDtypeStruct((rows, lane), dtype),
        grid_spec=pltpu.PrefetchScalarGridSpec(
            num_scalar_prefetch=0,
            grid=grid,
            in_specs=[
                pl.BlockSpec(memory_space=pltpu.MemorySpace.SMEM),  # max_value
                pl.BlockSpec((block_rows, lane), lambda i: (i, 0)),
            ],
            out_specs=pl.BlockSpec((block_rows, lane), lambda i: (i, 0)),
        ),
        compiler_params=pltpu.CompilerParams(**cp_kwargs),
        cost_estimate=pl.CostEstimate(
            flops=n, transcendentals=n, bytes_accessed=2 * nbytes
        ),
    )(scale, x2d)

    return jnp.reshape(out2d, orig_shape)


if __name__ == "__main__":
    key = jax.random.PRNGKey(0)
    max_value = 3.0  # symmetric-range parameter from __init__

    def ref_fn(x):
        return (max_value * jnp.tanh(x.astype(jnp.float32))).astype(x.dtype)

    cases = [
        ((2, 4, 16, 16), jnp.float32),    # tiny: fused-XLA fast path
        ((2, 4, 64, 64), jnp.float32),    # 128 KiB: kernel path, single block
        ((4, 8, 64, 64), jnp.bfloat16),   # 256 KiB bf16: kernel, 16-row sublane blocks
        ((8, 8, 128, 128), jnp.float32),  # 2 MiB: kernel, >=2 grid steps
        ((2, 4, 16, 5), jnp.float32),     # odd size (n % 128 != 0): fallback
    ]
    for i, (shape, dtype) in enumerate(cases):
        k = jax.random.fold_in(key, i)
        x = jax.random.normal(k, shape, dtype=jnp.float32).astype(dtype)
        out = jax.block_until_ready(coords(x, max_value))
        ref = ref_fn(x)
        assert out.shape == x.shape and out.dtype == x.dtype, shape
        tol = 1e-5 if dtype == jnp.float32 else 2e-2
        assert jnp.allclose(
            out.astype(jnp.float32), ref.astype(jnp.float32), atol=tol, rtol=tol
        ), shape

    print("KERNEL_OK")
</pallas_src>

<mosaic_0001>
module attributes {stable_mosaic.version = 11 : i64} {
  func.func @_coords_kernel(%arg0: i32, %arg1: memref<1xf32, #tpu.memory_space<smem>>, %arg2: memref<16x2048xf32, #tpu.memory_space<vmem>>, %arg3: memref<16x2048xf32, #tpu.memory_space<vmem>>) attributes {dimension_semantics = [#tpu.dimension_semantics<parallel>], iteration_bounds = array<i64: 1>, scalar_prefetch = 0 : i64, scratch_operands = 0 : i64, tpu.core_type = #tpu.core_type<tc>, window_params = [{transform_indices = @transform_0, window_bounds = array<i64: 1>}, {transform_indices = @transform_1, window_bounds = array<i64: 16, 2048>}, {transform_indices = @transform_2, window_bounds = array<i64: 16, 2048>}]} {
    %c0 = arith.constant 0 : index
    %0 = memref.load %arg1[%c0] : memref<1xf32, #tpu.memory_space<smem>>
    %c0_0 = arith.constant 0 : index
    %c0_1 = arith.constant 0 : index
    %1 = vector.load %arg2[%c0_0, %c0_1] : memref<16x2048xf32, #tpu.memory_space<vmem>>, vector<16x2048xf32>
    %2 = math.tanh %1 : vector<16x2048xf32>
    %3 = vector.broadcast %0 : f32 to vector<16x2048xf32>
    %4 = arith.mulf %3, %2 : vector<16x2048xf32>
    %c0_2 = arith.constant 0 : index
    %c0_3 = arith.constant 0 : index
    %5 = vector.load %arg3[%c0_2, %c0_3] : memref<16x2048xf32, #tpu.memory_space<vmem>>, vector<16x2048xf32>
    tpu.vector_store %arg3[%c0_2, %c0_3], %4 {strides = array<i32>} : memref<16x2048xf32, #tpu.memory_space<vmem>>, vector<16x2048xf32>,
    return
  }
  func.func @transform_0(%arg0: i32) -> i32 {
    %c0_i32 = arith.constant 0 : i32
    %c0_i32_0 = arith.constant 0 : i32
    return %c0_i32 : i32
  }
  func.func @transform_1(%arg0: i32) -> (i32, i32) {
    %c0_i32 = arith.constant 0 : i32
    %c0_i32_0 = arith.constant 0 : i32
    return %arg0, %c0_i32 : i32, i32
  }
  func.func @transform_2(%arg0: i32) -> (i32, i32) {
    %c0_i32 = arith.constant 0 : i32
    %c0_i32_0 = arith.constant 0 : i32
    return %arg0, %c0_i32 : i32, i32
  }
}

</mosaic_0001>

<bundles_post_ra>
// kernel: tpu_custom_call.1
= control target key start
LH: loop header
LB: loop body
LE: loop exit
PB: predicated region body
PF: predicated region fallthrough
CT: control target
= control target key end

     0   :  { %8 = vsyncpa [#allocation4], 0  ;;  %s366_s0 = inlined_call_operand.<no memory space> [shape: f32[1], index: 0, kind: input, shape index: {}]   ;;  %s367_s1 = inlined_call_operand.hbm [shape: f32[16,2048], index: 1, kind: input, shape index: {}]   ;;  %s368_s2 = inlined_call_operand.hbm [shape: f32[16,2048], index: 2, kind: output, shape index: {}]  }
   0x1   :  { %9 = vsyncpa [#allocation5], 0  ;;  %s16_s11 = sshll.u32 %s367_s1, 4  ;;  %s298_s12 = smov [#allocation3]   ;;  %s17_s11 = int_to_ptr.hbm [resolvable:$true] %s16_s11 }
   0x2   :  { %s18_s13 = sshll.u32 %s298_s12, 4  ;;  %s299_s14 = smov 2048   ;;  %s19_s13 = int_to_ptr.vmem [resolvable:$true] %s18_s13 }
   0x3   :  { %s300_s15 = smov 128  }
   0x4   :  { %24 = dma.hbm_to_vmem [thread:$0]  %s17_s11, 4096, %s19_s13, [#allocation4], %s299_s14, %s299_s14, %s300_s15  }
   0x5   :  { %294 = dma.done.wait [#allocation4], 4096  }
   0x6   :  { %295 = vsyncadd [#allocation4], 4294963200  ;;  %v30_v0 = vld [vmem:[#allocation3] sm:$0xff]  ;;  %v31_v1 = vld [vmem:[#allocation3 + $0x8] sm:$0xff]  ;;  %v326_v7 = vstv %s366_s0  ;;  %s301_s0 = smov [#allocation6]   ;;  %s165_s20 = sshll.u32 %s368_s2, 4  ;;  %s166_s20 = int_to_ptr.hbm [resolvable:$true] %s165_s20 }
   0x7   :  { %v32_v2 = vld [vmem:[#allocation3 + $0x10] sm:$0xff]  ;;  %182 = vtanh.f32 %v30_v0  ;;  %v33_v3 = vld [vmem:[#allocation3 + $0x18] sm:$0xff]  ;;  %v34_v4 = vld [vmem:[#allocation3 + $0x20] sm:$0xff]  ;;  %s163_s17 = sshll.u32 %s301_s0, 4  ;;  %s164_s17 = int_to_ptr.vmem [resolvable:$true] %s163_s17 }
   0x8   :  { %184 = vtanh.f32 %v31_v1  ;;  %v35_v5 = vld [vmem:[#allocation3 + $0x28] sm:$0xff]  ;;  %v36_v6 = vld [vmem:[#allocation3 + $0x30] sm:$0xff]  ;;  %v37_v8 = vld [vmem:[#allocation3 + $0x38] sm:$0xff] }
   0x9   :  { %186 = vtanh.f32 %v32_v2  ;;  %v38_v9 = vld [vmem:[#allocation3 + $0x40] sm:$0xff]  ;;  %v39_v11 = vld [vmem:[#allocation3 + $0x48] sm:$0xff]  ;;  %v40_v14 = vld [vmem:[#allocation3 + $0x50] sm:$0xff] }
   0xa   :  { %188 = vtanh.f32 %v33_v3  ;;  %v41_v17 = vld [vmem:[#allocation3 + $0x58] sm:$0xff]  ;;  %v42_v20 = vld [vmem:[#allocation3 + $0x60] sm:$0xff]  ;;  %v43_v23 = vld [vmem:[#allocation3 + $0x68] sm:$0xff] }
   0xb   :  { %190 = vtanh.f32 %v34_v4  ;;  %v44_v26 = vld [vmem:[#allocation3 + $0x70] sm:$0xff]  ;;  %v45_v29 = vld [vmem:[#allocation3 + $0x78] sm:$0xff]  ;;  %v46_v32 = vld [vmem:[#allocation3 + $0x80] sm:$0xff] }
   0xc   :  { %192 = vtanh.f32 %v35_v5  ;;  %v47_v35 = vld [vmem:[#allocation3 + $0x88] sm:$0xff]  ;;  %v48_v38 = vld [vmem:[#allocation3 + $0x90] sm:$0xff]  ;;  %v49_v41 = vld [vmem:[#allocation3 + $0x98] sm:$0xff] }
   0xd   :  { %v183_v10 = vpop.eup %182  ;;  %194 = vtanh.f32 %v36_v6  ;;  %v50_v44 = vld [vmem:[#allocation3 + $0xa0] sm:$0xff]  ;;  %v51_v47 = vld [vmem:[#allocation3 + $0xa8] sm:$0xff]  ;;  %v52_v50 = vld [vmem:[#allocation3 + $0xb0] sm:$0xff] }
   0xe   :  { %v185_v12 = vpop.eup %184  ;;  %v95_v13 = vmul.f32 %v183_v10, %v326_v7  ;;  %196 = vtanh.f32 %v37_v8  ;;  %v53_v53 = vld [vmem:[#allocation3 + $0xb8] sm:$0xff]  ;;  %v54_v56 = vld [vmem:[#allocation3 + $0xc0] sm:$0xff]  ;;  %v55_v59 = vld [vmem:[#allocation3 + $0xc8] sm:$0xff] }
   0xf   :  { %v187_v15 = vpop.eup %186  ;;  %v96_v16 = vmul.f32 %v185_v12, %v326_v7  ;;  %198 = vtanh.f32 %v38_v9  ;;  %v56_v62 = vld [vmem:[#allocation3 + $0xd0] sm:$0xff]  ;;  %v57_v1 = vld [vmem:[#allocation3 + $0xd8] sm:$0xff]  ;;  %v58_v4 = vld [vmem:[#allocation3 + $0xe0] sm:$0xff] }
  0x10   :  { %v189_v18 = vpop.eup %188  ;;  %127 = vst [vmem:[#allocation6] sm:$0xff] %v95_v13  ;;  %v97_v19 = vmul.f32 %v187_v15, %v326_v7  ;;  %200 = vtanh.f32 %v39_v11  ;;  %v59_v8 = vld [vmem:[#allocation3 + $0xe8] sm:$0xff]  ;;  %v60_v11 = vld [vmem:[#allocation3 + $0xf0] sm:$0xff] }
  0x11   :  { %v191_v21 = vpop.eup %190  ;;  %128 = vst [vmem:[#allocation6 + $0x8] sm:$0xff] %v96_v16  ;;  %v98_v22 = vmul.f32 %v189_v18, %v326_v7  ;;  %202 = vtanh.f32 %v40_v14  ;;  %v61_v14 = vld [vmem:[#allocation3 + $0xf8] sm:$0xff] }
  0x12   :  { %v193_v24 = vpop.eup %192  ;;  %129 = vst [vmem:[#allocation6 + $0x10] sm:$0xff] %v97_v19  ;;  %v99_v25 = vmul.f32 %v191_v21, %v326_v7  ;;  %204 = vtanh.f32 %v41_v17 }
  0x13   :  { %v195_v27 = vpop.eup %194  ;;  %130 = vst [vmem:[#allocation6 + $0x18] sm:$0xff] %v98_v22  ;;  %v100_v28 = vmul.f32 %v193_v24, %v326_v7  ;;  %206 = vtanh.f32 %v42_v20 }
  0x14   :  { %v197_v30 = vpop.eup %196  ;;  %131 = vst [vmem:[#allocation6 + $0x20] sm:$0xff] %v99_v25  ;;  %v101_v31 = vmul.f32 %v195_v27, %v326_v7  ;;  %208 = vtanh.f32 %v43_v23 }
  0x15   :  { %v199_v33 = vpop.eup %198  ;;  %132 = vst [vmem:[#allocation6 + $0x28] sm:$0xff] %v100_v28  ;;  %v102_v34 = vmul.f32 %v197_v30, %v326_v7  ;;  %210 = vtanh.f32 %v44_v26 }
  0x16   :  { %v201_v36 = vpop.eup %200  ;;  %133 = vst [vmem:[#allocation6 + $0x30] sm:$0xff] %v101_v31  ;;  %v103_v37 = vmul.f32 %v199_v33, %v326_v7  ;;  %212 = vtanh.f32 %v45_v29 }
  0x17   :  { %v203_v39 = vpop.eup %202  ;;  %134 = vst [vmem:[#allocation6 + $0x38] sm:$0xff] %v102_v34  ;;  %v104_v40 = vmul.f32 %v201_v36, %v326_v7  ;;  %214 = vtanh.f32 %v46_v32 }
  0x18   :  { %v205_v42 = vpop.eup %204  ;;  %135 = vst [vmem:[#allocation6 + $0x40] sm:$0xff] %v103_v37  ;;  %v105_v43 = vmul.f32 %v203_v39, %v326_v7  ;;  %216 = vtanh.f32 %v47_v35 }
  0x19   :  { %v207_v45 = vpop.eup %206  ;;  %136 = vst [vmem:[#allocation6 + $0x48] sm:$0xff] %v104_v40  ;;  %v106_v46 = vmul.f32 %v205_v42, %v326_v7  ;;  %218 = vtanh.f32 %v48_v38 }
  0x1a   :  { %v209_v48 = vpop.eup %208  ;;  %137 = vst [vmem:[#allocation6 + $0x50] sm:$0xff] %v105_v43  ;;  %v107_v49 = vmul.f32 %v207_v45, %v326_v7  ;;  %220 = vtanh.f32 %v49_v41 }
  0x1b   :  { %v211_v51 = vpop.eup %210  ;;  %138 = vst [vmem:[#allocation6 + $0x58] sm:$0xff] %v106_v46  ;;  %v108_v52 = vmul.f32 %v209_v48, %v326_v7  ;;  %222 = vtanh.f32 %v50_v44 }
  0x1c   :  { %v213_v54 = vpop.eup %212  ;;  %139 = vst [vmem:[#allocation6 + $0x60] sm:$0xff] %v107_v49  ;;  %v109_v55 = vmul.f32 %v211_v51, %v326_v7  ;;  %224 = vtanh.f32 %v51_v47 }
  0x1d   :  { %v215_v57 = vpop.eup %214  ;;  %140 = vst [vmem:[#allocation6 + $0x68] sm:$0xff] %v108_v52  ;;  %v110_v58 = vmul.f32 %v213_v54, %v326_v7  ;;  %226 = vtanh.f32 %v52_v50 }
  0x1e   :  { %v217_v60 = vpop.eup %216  ;;  %141 = vst [vmem:[#allocation6 + $0x70] sm:$0xff] %v109_v55  ;;  %v111_v61 = vmul.f32 %v215_v57, %v326_v7  ;;  %228 = vtanh.f32 %v53_v53 }
  0x1f   :  { %v219_v63 = vpop.eup %218  ;;  %142 = vst [vmem:[#allocation6 + $0x78] sm:$0xff] %v110_v58  ;;  %v112_v0 = vmul.f32 %v217_v60, %v326_v7  ;;  %230 = vtanh.f32 %v54_v56 }
  0x20   :  { %v221_v2 = vpop.eup %220  ;;  %143 = vst [vmem:[#allocation6 + $0x80] sm:$0xff] %v111_v61  ;;  %v113_v3 = vmul.f32 %v219_v63, %v326_v7  ;;  %232 = vtanh.f32 %v55_v59 }
  0x21   :  { %v223_v5 = vpop.eup %222  ;;  %144 = vst [vmem:[#allocation6 + $0x88] sm:$0xff] %v112_v0  ;;  %v114_v6 = vmul.f32 %v221_v2, %v326_v7  ;;  %234 = vtanh.f32 %v56_v62 }
  0x22   :  { %v225_v9 = vpop.eup %224  ;;  %145 = vst [vmem:[#allocation6 + $0x90] sm:$0xff] %v113_v3  ;;  %v115_v10 = vmul.f32 %v223_v5, %v326_v7  ;;  %236 = vtanh.f32 %v57_v1 }
  0x23   :  { %v227_v12 = vpop.eup %226  ;;  %146 = vst [vmem:[#allocation6 + $0x98] sm:$0xff] %v114_v6  ;;  %v116_v13 = vmul.f32 %v225_v9, %v326_v7  ;;  %238 = vtanh.f32 %v58_v4 }
  0x24   :  { %v229_v15 = vpop.eup %228  ;;  %147 = vst [vmem:[#allocation6 + $0xa0] sm:$0xff] %v115_v10  ;;  %v117_v16 = vmul.f32 %v227_v12, %v326_v7  ;;  %240 = vtanh.f32 %v59_v8 }
  0x25   :  { %v231_v17 = vpop.eup %230  ;;  %148 = vst [vmem:[#allocation6 + $0xa8] sm:$0xff] %v116_v13  ;;  %v118_v18 = vmul.f32 %v229_v15, %v326_v7  ;;  %242 = vtanh.f32 %v60_v11 }
  0x26   :  { %v233_v19 = vpop.eup %232  ;;  %149 = vst [vmem:[#allocation6 + $0xb0] sm:$0xff] %v117_v16  ;;  %v119_v20 = vmul.f32 %v231_v17, %v326_v7  ;;  %244 = vtanh.f32 %v61_v14 }
  0x27   :  { %v235_v21 = vpop.eup %234  ;;  %150 = vst [vmem:[#allocation6 + $0xb8] sm:$0xff] %v118_v18  ;;  %v120_v22 = vmul.f32 %v233_v19, %v326_v7 }
  0x28   :  { %v237_v23 = vpop.eup %236  ;;  %151 = vst [vmem:[#allocation6 + $0xc0] sm:$0xff] %v119_v20  ;;  %v121_v24 = vmul.f32 %v235_v21, %v326_v7 }
  0x29   :  { %v239_v25 = vpop.eup %238  ;;  %152 = vst [vmem:[#allocation6 + $0xc8] sm:$0xff] %v120_v22  ;;  %v122_v26 = vmul.f32 %v237_v23, %v326_v7 }
  0x2a   :  { %v241_v27 = vpop.eup %240  ;;  %153 = vst [vmem:[#allocation6 + $0xd0] sm:$0xff] %v121_v24  ;;  %v123_v28 = vmul.f32 %v239_v25, %v326_v7 }
  0x2b   :  { %v243_v29 = vpop.eup %242  ;;  %154 = vst [vmem:[#allocation6 + $0xd8] sm:$0xff] %v122_v26  ;;  %v124_v30 = vmul.f32 %v241_v27, %v326_v7 }
  0x2c   :  { %v245_v31 = vpop.eup %244  ;;  %155 = vst [vmem:[#allocation6 + $0xe0] sm:$0xff] %v123_v28  ;;  %v125_v32 = vmul.f32 %v243_v29, %v326_v7 }
  0x2d   :  { %156 = vst [vmem:[#allocation6 + $0xe8] sm:$0xff] %v124_v30  ;;  %v126_v33 = vmul.f32 %v245_v31, %v326_v7 }
  0x2e   :  { %157 = vst [vmem:[#allocation6 + $0xf0] sm:$0xff] %v125_v32 }
  0x2f   :  { %158 = vst [vmem:[#allocation6 + $0xf8] sm:$0xff] %v126_v33 }
  0x30   :  { %171 = dma.vmem_to_hbm [thread:$0]  %s164_s17, 4096, %s166_s20, [#allocation5], %s299_s14, %s299_s14, %s300_s15  }
  0x31   :  { %296 = dma.done.wait [#allocation5], 4096  }
  0x32   :  { %297 = vsyncadd [#allocation5], 4294963200 }
  0x33   :  { %176 = vsyncpa [#allocation4], 1 }
  0x34   :  { %177 = vsyncpa [#allocation5], 1 }

</bundles_post_ra>
